<compile_context>
chip_gen: v5e
topology: v5e:2x2
jax: 0.10.0
libtpu: 0.0.40
codegen_flags: <defaults>
</compile_context>

<pallas_src>
import functools

import jax
import jax.numpy as jnp
from jax.experimental import pallas as pl
from jax.experimental.pallas import tpu as pltpu


def _rvq_kernel(z_ref, cb_ref, csq_ref,
                qout_ref, zq_ref, idx_ref, err_ref,
                res_ref, *, scores_dtype):
    """Fused residual-VQ step for one (batch, token tile, quantizer) grid point.

    Grid: (B, T_tiles, nq) -- quantizer axis innermost ("arbitrary").

    z_ref   : (D, TT)       f32  input encodings for this (b, t) tile
    cb_ref  : (nq, D, K)    f32  ALL codebooks, K on lanes, resident in VMEM
    csq_ref : (nq, K, 1)    f32  0.5*||c_k||^2, resident in VMEM
    qout_ref: (D, TT)       f32  accumulated quantized output (resident over q)
    zq_ref  : (D, TT)       f32  per-quantizer quantized output
    idx_ref : (1, TT)       i32  nearest-code indices
    err_ref : (1, TT)       f32  per-token sum_D (z_e - z_q)^2
    res_ref : (D, TT)       f32  VMEM scratch carrying the residual across q
    """
    q = pl.program_id(2)

    @pl.when(q == 0)
    def _():
        res_ref[...] = z_ref[...]
        qout_ref[...] = jnp.zeros_like(qout_ref)

    e = res_ref[...]                                   # (D, TT) current residual
    c = cb_ref[q]                                      # (D, K)  K on lanes
    half_csq = csq_ref[q]                              # (K, 1)

    # scores[k, t] = <c_k, e_t> (contract over D).  Optionally run this matmul
    # in bf16 (MXU-native path on v5e/v6e/v7x); accumulation stays f32.
    scores = jax.lax.dot_general(
        c.astype(scores_dtype), e.astype(scores_dtype),
        dimension_numbers=(((0,), (0,)), ((), ())),
        preferred_element_type=jnp.float32)            # (K, TT)

    # argmin_k ||e_t - c_k||^2 == first-argmax_k (<c_k, e_t> - 0.5||c_k||^2)
    # (||e_t||^2 is constant per token and dropped from the ranking).
    adj = scores - half_csq                            # (K, TT)
    k_iota = jax.lax.broadcasted_iota(jnp.int32, adj.shape, 0)
    best = jnp.max(adj, axis=0, keepdims=True)         # (1, TT)
    idx = jnp.min(jnp.where(adj >= best, k_iota, adj.shape[0]),
                  axis=0, keepdims=True)               # (1, TT) i32, first max

    # Exact gather of the selected codebook rows via a one-hot matmul; kept in
    # f32 so z_q is an exact codebook row and the residual does not drift.
    onehot = (k_iota == idx).astype(jnp.float32)       # (K, TT)
    zq = jax.lax.dot_general(
        c, onehot, dimension_numbers=(((1,), (0,)), ((), ())),
        preferred_element_type=jnp.float32)            # (D, TT)

    diff = e - zq
    qout_ref[...] += zq
    res_ref[...] = diff                                # residual for next q
    zq_ref[...] = zq
    idx_ref[...] = idx
    err_ref[...] = jnp.sum(diff * diff, axis=0, keepdims=True)


def _round_up(x, m):
    return ((x + m - 1) // m) * m


@functools.partial(jax.jit, static_argnames=("n_quantizers", "tile_t",
                                             "scores_dtype"))
def residual_vq_forward(z, codebooks, n_quantizers=None, *, tile_t=512,
                        scores_dtype=jnp.float32):
    """ResidualVQ.forward (eval mode).

    z         : (B, D, T) float32  -- PyTorch NCW layout
    codebooks : (N, K, D) float32  -- nn.Embedding weights per quantizer

    Returns (quantized_out[B,D,T], all_indices[N,B,T], all_commit_losses[N],
             all_codebook_losses[N], all_quantized[N,B,D,T]).
    """
    B, D, T = z.shape
    N, K, Dc = codebooks.shape
    assert Dc == D, "input_dim must equal codebook_dim (projections are Identity)"
    nq = N if n_quantizers is None else min(int(n_quantizers), N)

    # --- token (lane) tiling along T; no layout transposes of z / outputs ----
    t128 = _round_up(T, 128)
    n128 = t128 // 128
    max_m = max(1, min(n128, max(tile_t, 128) // 128))
    # keep >= 2 parallel (b, t) tiles when possible so both v7x TensorCores work
    want_tiles = 2 if B == 1 else 1
    cand = [m for m in range(1, max_m + 1)
            if n128 % m == 0 and (n128 // m) >= want_tiles]
    if not cand:
        cand = [m for m in range(1, max_m + 1) if n128 % m == 0]
    tt = max(cand) * 128
    t_pad = t128
    n_tt = t_pad // tt

    z_p = z.astype(jnp.float32)
    if t_pad != T:
        z_p = jnp.pad(z_p, ((0, 0), (0, 0), (0, t_pad - T)))

    # --- codebooks: K-on-lanes (nq, D, K) + exact 0.5*||c||^2, hoisted once ---
    cb = jnp.transpose(codebooks[:nq].astype(jnp.float32), (0, 2, 1))  # (nq,D,K)
    csq_half = 0.5 * jnp.sum(cb * cb, axis=1)[..., None]               # (nq,K,1)

    # --- VMEM budget (resident codebooks + tiles + (K,TT) intermediates) -----
    resident = 2 * 4 * (cb.size + csq_half.size)
    per_tile = 4 * ((2 * 3 * D + D) * tt + 4 * 2 * tt)
    interm = 4 * 6 * K * tt
    vmem_limit = max(32 << 20,
                     min(64 << 20, int(1.3 * (resident + per_tile + interm))))

    kernel = functools.partial(_rvq_kernel, scores_dtype=scores_dtype)

    qout, zq_all, idx_all, err_all = pl.pallas_call(
        kernel,
        out_shape=(
            jax.ShapeDtypeStruct((B, D, t_pad), jnp.float32),
            jax.ShapeDtypeStruct((nq, B, D, t_pad), jnp.float32),
            jax.ShapeDtypeStruct((nq, B, 1, t_pad), jnp.int32),
            jax.ShapeDtypeStruct((nq, B, 1, t_pad), jnp.float32),
        ),
        grid_spec=pltpu.PrefetchScalarGridSpec(
            num_scalar_prefetch=0,
            grid=(B, n_tt, nq),                       # quantizer axis innermost
            in_specs=[
                pl.BlockSpec((None, D, tt), lambda b, t, q: (b, 0, t)),
                # constant index_map => codebooks fetched once, VMEM-resident
                pl.BlockSpec((nq, D, K), lambda b, t, q: (0, 0, 0)),
                pl.BlockSpec((nq, K, 1), lambda b, t, q: (0, 0, 0)),
            ],
            out_specs=[
                pl.BlockSpec((None, D, tt), lambda b, t, q: (b, 0, t)),       # acc
                pl.BlockSpec((None, None, D, tt), lambda b, t, q: (q, b, 0, t)),
                pl.BlockSpec((None, None, 1, tt), lambda b, t, q: (q, b, 0, t)),
                pl.BlockSpec((None, None, 1, tt), lambda b, t, q: (q, b, 0, t)),
            ],
            scratch_shapes=[pltpu.VMEM((D, tt), jnp.float32)],   # residual
        ),
        compiler_params=pltpu.CompilerParams(
            dimension_semantics=("parallel", "parallel", "arbitrary"),
            vmem_limit_bytes=vmem_limit,
        ),
    )(z_p, cb, csq_half)

    # strip token padding; all tensors are already in their final layouts.
    quantized_out = qout[..., :T]                       # (B, D, T)
    all_quantized = zq_all[..., :T]                     # (N, B, D, T)
    all_indices = idx_all[:, :, 0, :T]                  # (N, B, T)
    err = err_all[:, :, 0, :T]                          # (N, B, T)
    # commit / codebook losses share forward values:
    # mse(z_e, z_q) mean over (D,T) per batch element, then mean over B.
    per_batch = err.sum(axis=-1) / (D * T)              # (N, B)
    losses = per_batch.mean(axis=-1)                    # (N,)
    return quantized_out, all_indices, losses, losses, all_quantized


def _ref_residual_vq(z, codebooks):
    """Pure-JAX reference (same math, full f32, no Pallas) for verification."""
    B, D, T = z.shape
    residual = z.astype(jnp.float32)
    qout = jnp.zeros_like(residual)
    idxs, zqs, losses = [], [], []
    for cb in codebooks:
        csq = jnp.sum(cb * cb, axis=-1)                                # (K,)
        scores = jnp.einsum('kd,bdt->kbt', cb, residual,
                            precision=jax.lax.Precision.HIGHEST)      # (K,B,T)
        rank = csq[:, None, None] - 2.0 * scores
        idx = jnp.argmin(rank, axis=0)                                 # (B, T)
        zq = jnp.transpose(jnp.take(cb, idx, axis=0), (0, 2, 1))       # (B,D,T)
        err = jnp.sum((residual - zq) ** 2, axis=1)                    # (B, T)
        losses.append((err.sum(-1) / (D * T)).mean())
        idxs.append(idx)
        zqs.append(zq)
        qout = qout + zq
        residual = residual - zq
    return (qout, jnp.stack(idxs), jnp.stack(losses), jnp.stack(losses),
            jnp.stack(zqs))


if __name__ == "__main__":
    # Small, deterministic configuration (input_dim == codebook_dim).
    B, D, T = 2, 32, 128          # batch, channels, time
    N, K = 4, 128                 # num_quantizers, codebook_size

    key = jax.random.PRNGKey(0)
    kz, kc = jax.random.split(key)
    z = jax.random.normal(kz, (B, D, T), dtype=jnp.float32)
    codebooks = jax.random.normal(kc, (N, K, D), dtype=jnp.float32)

    ref = _ref_residual_vq(z, codebooks)

    # ---- exact (f32 scores) path: strict checks against the JAX reference ----
    outs = jax.block_until_ready(residual_vq_forward(z, codebooks))
    quantized_out, all_indices, commit, codebook_loss, all_quantized = outs

    assert quantized_out.shape == (B, D, T)
    assert all_indices.shape == (N, B, T)
    assert commit.shape == (N,) and codebook_loss.shape == (N,)
    assert all_quantized.shape == (N, B, D, T)
    assert bool(jnp.all(all_indices == ref[1]))
    assert jnp.allclose(quantized_out, ref[0], atol=1e-3, rtol=1e-3)
    assert jnp.allclose(all_quantized, ref[4], atol=1e-3, rtol=1e-3)
    assert jnp.allclose(commit, ref[2], atol=1e-4, rtol=1e-4)

    # ---- bf16-scores path (fast MXU path on v5e/v6e/v7x) ---------------------
    outs_bf = jax.block_until_ready(
        residual_vq_forward(z, codebooks, scores_dtype=jnp.bfloat16))
    q_bf, idx_bf, commit_bf, _, zq_bf = outs_bf
    # selected codes are exact codebook rows (gather matmul stays f32) ...
    exp_zq = jax.vmap(lambda cb, ix: jnp.take(cb, ix, axis=0))(codebooks, idx_bf)
    exp_zq = jnp.transpose(exp_zq, (0, 1, 3, 2))                    # (N,B,D,T)
    assert jnp.allclose(zq_bf, exp_zq, atol=1e-3, rtol=1e-3)
    # ... quantized_out is their running sum ...
    assert jnp.allclose(q_bf, zq_bf.sum(axis=0), atol=1e-3, rtol=1e-3)
    # ... and losses stay close to full precision (near-tie argmin flips allowed)
    assert jnp.allclose(commit_bf, ref[2], rtol=0.1, atol=1e-2)

    print("KERNEL_OK")
</pallas_src>

<mosaic_0001>
module attributes {stable_mosaic.version = 11 : i64} {
  func.func @_rvq_kernel(%arg0: i32, %arg1: i32, %arg2: i32, %arg3: memref<1x32x128xf32, #tpu.memory_space<vmem>>, %arg4: memref<4x32x128xf32, #tpu.memory_space<vmem>>, %arg5: memref<4x128x1xf32, #tpu.memory_space<vmem>>, %arg6: memref<1x32x128xf32, #tpu.memory_space<vmem>>, %arg7: memref<1x1x32x128xf32, #tpu.memory_space<vmem>>, %arg8: memref<1x1x1x128xi32, #tpu.memory_space<vmem>>, %arg9: memref<1x1x1x128xf32, #tpu.memory_space<vmem>>, %arg10: memref<32x128xf32, #tpu.memory_space<vmem>>) attributes {dimension_semantics = [#tpu.dimension_semantics<parallel>, #tpu.dimension_semantics<parallel>, #tpu.dimension_semantics<arbitrary>], iteration_bounds = array<i64: 2, 1, 4>, scalar_prefetch = 0 : i64, scratch_operands = 1 : i64, tpu.core_type = #tpu.core_type<tc>, window_params = [{transform_indices = @transform_0, window_bounds = array<i64: 1, 32, 128>}, {pipeline_mode = #tpu.pipeline_mode<synchronous>, transform_indices = @transform_1, window_bounds = array<i64: 4, 32, 128>}, {pipeline_mode = #tpu.pipeline_mode<synchronous>, transform_indices = @transform_2, window_bounds = array<i64: 4, 128, 1>}, {transform_indices = @transform_3, window_bounds = array<i64: 1, 32, 128>}, {transform_indices = @transform_4, window_bounds = array<i64: 1, 1, 32, 128>}, {transform_indices = @transform_5, window_bounds = array<i64: 1, 1, 1, 128>}, {transform_indices = @transform_6, window_bounds = array<i64: 1, 1, 1, 128>}]} {
    %c0_i32 = arith.constant 0 : i32
    %0 = arith.cmpi eq, %arg2, %c0_i32 : i32
    %1 = arith.extui %0 : i1 to i32
    %c0_i32_0 = arith.constant 0 : i32
    %2 = arith.cmpi ne, %1, %c0_i32_0 : i32
    scf.if %2 {
      %c0_30 = arith.constant 0 : index
      %c0_31 = arith.constant 0 : index
      %c0_32 = arith.constant 0 : index
      %47 = vector.load %arg3[%c0_30, %c0_31, %c0_32] : memref<1x32x128xf32, #tpu.memory_space<vmem>>, vector<1x32x128xf32>
      %48 = vector.shape_cast %47 : vector<1x32x128xf32> to vector<32x128xf32>
      %c0_33 = arith.constant 0 : index
      %c0_34 = arith.constant 0 : index
      %49 = vector.load %arg10[%c0_33, %c0_34] : memref<32x128xf32, #tpu.memory_space<vmem>>, vector<32x128xf32>
      tpu.vector_store %arg10[%c0_33, %c0_34], %48 {strides = array<i32>} : memref<32x128xf32, #tpu.memory_space<vmem>>, vector<32x128xf32>,
      %cst_35 = arith.constant 0.000000e+00 : f32
      %50 = vector.broadcast %cst_35 : f32 to vector<32x128xf32>
      %c0_36 = arith.constant 0 : index
      %c0_37 = arith.constant 0 : index
      %c0_38 = arith.constant 0 : index
      %51 = vector.load %arg6[%c0_36, %c0_37, %c0_38] : memref<1x32x128xf32, #tpu.memory_space<vmem>>, vector<1x32x128xf32>
      %52 = vector.shape_cast %51 : vector<1x32x128xf32> to vector<32x128xf32>
      %53 = vector.shape_cast %50 : vector<32x128xf32> to vector<1x32x128xf32>
      tpu.vector_store %arg6[%c0_36, %c0_37, %c0_38], %53 {strides = array<i32>} : memref<1x32x128xf32, #tpu.memory_space<vmem>>, vector<1x32x128xf32>,
    } else {
    }
    %c0 = arith.constant 0 : index
    %c0_1 = arith.constant 0 : index
    %3 = vector.load %arg10[%c0, %c0_1] : memref<32x128xf32, #tpu.memory_space<vmem>>, vector<32x128xf32>
    %4 = arith.index_cast %arg2 : i32 to index
    %c0_2 = arith.constant 0 : index
    %c0_3 = arith.constant 0 : index
    %5 = vector.load %arg4[%4, %c0_2, %c0_3] : memref<4x32x128xf32, #tpu.memory_space<vmem>>, vector<1x32x128xf32>
    %6 = vector.shape_cast %5 : vector<1x32x128xf32> to vector<32x128xf32>
    %7 = arith.index_cast %arg2 : i32 to index
    %c0_4 = arith.constant 0 : index
    %c0_5 = arith.constant 0 : index
    %8 = vector.load %arg5[%7, %c0_4, %c0_5] : memref<4x128x1xf32, #tpu.memory_space<vmem>>, vector<1x128x1xf32>
    %9 = vector.shape_cast %8 : vector<1x128x1xf32> to vector<128x1xf32>
    %cst = arith.constant dense<0.000000e+00> : vector<128x128xf32>
    %10 = tpu.matmul %6, %3, %cst {dimension_numbers = #tpu.dot_dimension_numbers<[0], [0], [1], [1], [0, 1, 1, 1], [], []>} : vector<32x128xf32>, vector<32x128xf32>, vector<128x128xf32> -> vector<128x128xf32>
    %11 = vector.broadcast %9 : vector<128x1xf32> to vector<128x128xf32>
    %12 = arith.subf %10, %11 : vector<128x128xf32>
    %13 = tpu.iota {dimensions = array<i32: 0>} : vector<128x128xi32>
    %cst_6 = arith.constant dense<0xFF800000> : vector<128xf32>
    %14 = vector.multi_reduction <maximumf>, %12, %cst_6 [0] : vector<128x128xf32> to vector<128xf32>
    %15 = vector.shape_cast %14 : vector<128xf32> to vector<1x128xf32>
    %16 = vector.broadcast %15 : vector<1x128xf32> to vector<128x128xf32>
    %17 = arith.cmpf oge, %12, %16 : vector<128x128xf32>
    %c128_i32 = arith.constant 128 : i32
    %18 = vector.broadcast %c128_i32 : i32 to vector<128x128xi32>
    %19 = arith.select %17, %13, %18 : vector<128x128xi1>, vector<128x128xi32>
    %cst_7 = arith.constant dense<2147483647> : vector<128xi32>
    %20 = vector.multi_reduction <minsi>, %19, %cst_7 [0] : vector<128x128xi32> to vector<128xi32>
    %21 = vector.shape_cast %20 : vector<128xi32> to vector<1x128xi32>
    %22 = vector.broadcast %21 : vector<1x128xi32> to vector<128x128xi32>
    %23 = arith.cmpi eq, %13, %22 : vector<128x128xi32>
    %24 = arith.extui %23 : vector<128x128xi1> to vector<128x128xi32>
    %25 = arith.sitofp %24 : vector<128x128xi32> to vector<128x128xf32>
    %cst_8 = arith.constant dense<0.000000e+00> : vector<32x128xf32>
    %26 = tpu.matmul %6, %25, %cst_8 {dimension_numbers = #tpu.dot_dimension_numbers<[1], [0], [0], [1], [0, 0, 1, 1], [], []>} : vector<32x128xf32>, vector<128x128xf32>, vector<32x128xf32> -> vector<32x128xf32>
    %27 = arith.subf %3, %26 : vector<32x128xf32>
    %c0_9 = arith.constant 0 : index
    %c0_10 = arith.constant 0 : index
    %c0_11 = arith.constant 0 : index
    %28 = vector.load %arg6[%c0_9, %c0_10, %c0_11] : memref<1x32x128xf32, #tpu.memory_space<vmem>>, vector<1x32x128xf32>
    %29 = vector.shape_cast %28 : vector<1x32x128xf32> to vector<32x128xf32>
    %30 = arith.addf %29, %26 : vector<32x128xf32>
    %c0_12 = arith.constant 0 : index
    %c0_13 = arith.constant 0 : index
    %c0_14 = arith.constant 0 : index
    %31 = vector.load %arg6[%c0_12, %c0_13, %c0_14] : memref<1x32x128xf32, #tpu.memory_space<vmem>>, vector<1x32x128xf32>
    %32 = vector.shape_cast %31 : vector<1x32x128xf32> to vector<32x128xf32>
    %33 = vector.shape_cast %30 : vector<32x128xf32> to vector<1x32x128xf32>
    tpu.vector_store %arg6[%c0_12, %c0_13, %c0_14], %33 {strides = array<i32>} : memref<1x32x128xf32, #tpu.memory_space<vmem>>, vector<1x32x128xf32>,
    %c0_15 = arith.constant 0 : index
    %c0_16 = arith.constant 0 : index
    %34 = vector.load %arg10[%c0_15, %c0_16] : memref<32x128xf32, #tpu.memory_space<vmem>>, vector<32x128xf32>
    tpu.vector_store %arg10[%c0_15, %c0_16], %27 {strides = array<i32>} : memref<32x128xf32, #tpu.memory_space<vmem>>, vector<32x128xf32>,
    %c0_17 = arith.constant 0 : index
    %c0_18 = arith.constant 0 : index
    %c0_19 = arith.constant 0 : index
    %c0_20 = arith.constant 0 : index
    %35 = vector.load %arg7[%c0_17, %c0_18, %c0_19, %c0_20] : memref<1x1x32x128xf32, #tpu.memory_space<vmem>>, vector<1x1x32x128xf32>
    %36 = vector.shape_cast %35 : vector<1x1x32x128xf32> to vector<32x128xf32>
    %37 = vector.shape_cast %26 : vector<32x128xf32> to vector<1x1x32x128xf32>
    tpu.vector_store %arg7[%c0_17, %c0_18, %c0_19, %c0_20], %37 {strides = array<i32>} : memref<1x1x32x128xf32, #tpu.memory_space<vmem>>, vector<1x1x32x128xf32>,
    %c0_21 = arith.constant 0 : index
    %c0_22 = arith.constant 0 : index
    %c0_23 = arith.constant 0 : index
    %c0_24 = arith.constant 0 : index
    %38 = vector.load %arg8[%c0_21, %c0_22, %c0_23, %c0_24] : memref<1x1x1x128xi32, #tpu.memory_space<vmem>>, vector<1x1x1x128xi32>
    %39 = vector.shape_cast %38 : vector<1x1x1x128xi32> to vector<1x128xi32>
    %40 = vector.shape_cast %21 : vector<1x128xi32> to vector<1x1x1x128xi32>
    tpu.vector_store %arg8[%c0_21, %c0_22, %c0_23, %c0_24], %40 {strides = array<i32>} : memref<1x1x1x128xi32, #tpu.memory_space<vmem>>, vector<1x1x1x128xi32>,
    %41 = arith.mulf %27, %27 : vector<32x128xf32>
    %cst_25 = arith.constant dense<0.000000e+00> : vector<128xf32>
    %42 = vector.multi_reduction <add>, %41, %cst_25 [0] : vector<32x128xf32> to vector<128xf32>
    %43 = vector.shape_cast %42 : vector<128xf32> to vector<1x128xf32>
    %c0_26 = arith.constant 0 : index
    %c0_27 = arith.constant 0 : index
    %c0_28 = arith.constant 0 : index
    %c0_29 = arith.constant 0 : index
    %44 = vector.load %arg9[%c0_26, %c0_27, %c0_28, %c0_29] : memref<1x1x1x128xf32, #tpu.memory_space<vmem>>, vector<1x1x1x128xf32>
    %45 = vector.shape_cast %44 : vector<1x1x1x128xf32> to vector<1x128xf32>
    %46 = vector.shape_cast %43 : vector<1x128xf32> to vector<1x1x1x128xf32>
    tpu.vector_store %arg9[%c0_26, %c0_27, %c0_28, %c0_29], %46 {strides = array<i32>} : memref<1x1x1x128xf32, #tpu.memory_space<vmem>>, vector<1x1x1x128xf32>,
    return
  }
  func.func @transform_0(%arg0: i32, %arg1: i32, %arg2: i32) -> (i32, i32, i32) {
    %c0_i32 = arith.constant 0 : i32
    %c0_i32_0 = arith.constant 0 : i32
    return %arg0, %c0_i32, %arg1 : i32, i32, i32
  }
  func.func @transform_1(%arg0: i32, %arg1: i32, %arg2: i32) -> (i32, i32, i32) {
    %c0_i32 = arith.constant 0 : i32
    %c0_i32_0 = arith.constant 0 : i32
    %c0_i32_1 = arith.constant 0 : i32
    %c0_i32_2 = arith.constant 0 : i32
    return %c0_i32, %c0_i32_0, %c0_i32_1 : i32, i32, i32
  }
  func.func @transform_2(%arg0: i32, %arg1: i32, %arg2: i32) -> (i32, i32, i32) {
    %c0_i32 = arith.constant 0 : i32
    %c0_i32_0 = arith.constant 0 : i32
    %c0_i32_1 = arith.constant 0 : i32
    %c0_i32_2 = arith.constant 0 : i32
    return %c0_i32, %c0_i32_0, %c0_i32_1 : i32, i32, i32
  }
  func.func @transform_3(%arg0: i32, %arg1: i32, %arg2: i32) -> (i32, i32, i32) {
    %c0_i32 = arith.constant 0 : i32
    %c0_i32_0 = arith.constant 0 : i32
    return %arg0, %c0_i32, %arg1 : i32, i32, i32
  }
  func.func @transform_4(%arg0: i32, %arg1: i32, %arg2: i32) -> (i32, i32, i32, i32) {
    %c0_i32 = arith.constant 0 : i32
    %c0_i32_0 = arith.constant 0 : i32
    return %arg2, %arg0, %c0_i32, %arg1 : i32, i32, i32, i32
  }
  func.func @transform_5(%arg0: i32, %arg1: i32, %arg2: i32) -> (i32, i32, i32, i32) {
    %c0_i32 = arith.constant 0 : i32
    %c0_i32_0 = arith.constant 0 : i32
    return %arg2, %arg0, %c0_i32, %arg1 : i32, i32, i32, i32
  }
  func.func @transform_6(%arg0: i32, %arg1: i32, %arg2: i32) -> (i32, i32, i32, i32) {
    %c0_i32 = arith.constant 0 : i32
    %c0_i32_0 = arith.constant 0 : i32
    return %arg2, %arg0, %c0_i32, %arg1 : i32, i32, i32, i32
  }
}

</mosaic_0001>

<bundles_post_ra>
// kernel: residual_vq_forward.1
= control target key start
LH: loop header
LB: loop body
LE: loop exit
PB: predicated region body
PF: predicated region fallthrough
CT: control target
= control target key end

     0   :  { %s2060_s0 = inlined_call_operand.vmem [shape: f32[2,32,128], index: 0, kind: input, shape index: {}]   ;;  %s2061_s1 = inlined_call_operand.vmem [shape: f32[4,32,128], index: 1, kind: input, shape index: {}]   ;;  %s2062_s2 = inlined_call_operand.vmem [shape: f32[4,128,1], index: 2, kind: input, shape index: {}]   ;;  %s2063_s3 = inlined_call_operand.hbm [shape: f32[2,32,128], index: 3, kind: output, shape index: {0}]   ;;  %s2064_s4 = inlined_call_operand.hbm [shape: f32[4,2,32,128], index: 4, kind: output, shape index: {1}]   ;;  %s2065_s5 = inlined_call_operand.hbm [shape: s32[4,2,1,128], index: 5, kind: output, shape index: {2}]   ;;  %s2066_s6 = inlined_call_operand.vmem [shape: f32[4,2,1,128], index: 6, kind: output, shape index: {3}]  }
   0x1   :  { %2079 = sst [smem:[#allocation21_spill]] %s2060_s0 }
   0x2   :  { %12 = vsyncpa [#allocation4], 0 }
   0x3   :  { %14 = vsyncpa [#allocation4 + $0x1], 0 }
   0x4   :  { %15 = vsyncpa [#allocation6], 0 }
   0x5   :  { %17 = vsyncpa [#allocation6 + $0x1], 0  ;;  %s1541_s21 = smov 0   ;;  %s1543_s22 = smov 0  }
   0x6   :  { %s1545_s23 = smov 0   ;;  %s1547_s24 = smov 0  }
   0x7   :  { %s1549_s25 = smov 0   ;;  %s1551_s26 = smov 0  }
   0x8   :  { %s1553_s27 = smov 0   ;;  %s1555_s28 = smov 0  }
   0x9   :  { %s1557_s29 = smov 0   ;;  %s1559_s30 = smov 0  }
   0xa   :  { %s1561_s7 = smov 0  }
   0xb LB: > { %2080 = sst [smem:[#allocation10_spill]] %s1463_s22  ;;  %s2068_s8 = sadd.s32 4294967295, %s1499_s7   ;;  %s1499_s7 = sphi %s1561_s7, %s23_s7   ;;  %s1495_s30 = sphi %s1559_s30, %s2112_s30   ;;  %s1491_s29 = sphi %s1557_s29, %s2111_s29   ;;  %s1487_s28 = sphi %s1555_s28, %s2110_s28   ;;  %s1483_s27 = sphi %s1553_s27, %s2109_s27   ;;  %s1479_s26 = sphi %s1551_s26, %s2108_s26   ;;  %s1475_s25 = sphi %s1549_s25, %s2114_s25   ;;  %s1471_s24 = sphi %s1547_s24, %s2113_s24   ;;  %s1467_s23 = sphi %s1545_s23, %s2106_s23   ;;  %s1463_s22 = sphi %s1543_s22, %s2105_s22   ;;  %s1459_s21 = sphi %s1541_s21, %s2104_s21  }
   0xc   : > { %2081 = sst [smem:[#allocation11_spill]] %s1467_s23  ;;  %s2067_s9 = sadd.s32 4294967294, %s1499_s7  }
   0xd   : > { %2082 = sst [smem:[#allocation12_spill]] %s1479_s26  ;;  %s35_s10 = sadd.s32 1, %s1491_s29 }
   0xe   : > { %2083 = sst [smem:[#allocation13_spill]] %s1491_s29  ;;  %s42_s11 = sadd.s32 1, %s1495_s30 }
   0xf   : > { %2084 = sst [smem:[#allocation14_spill]] %s1495_s30  ;;  %p36_p0 = scmp.ge.s32.totalorder %s35_s10, 4 }
  0x10   : > { %s121_s12 = sadd.s32 1, %s1479_s26  ;;  %p131_p1 = scmp.ne.s32.totalorder %s1479_s26, %s1475_s25 }
  0x11   : > { %p1605_p2 = scmp.eq.s32.totalorder %s2068_s8, 7  ;;  %s2116_s10 = smov (%p36_p0, %s35_s10), 0 }
  0x12   : > { %2086 = sst [smem:[#allocation15_spill]] %s2116_s10  ;;  %s2118_s11 = smov (!%p36_p0, %s42_s11), %s1495_s30 }
  0x13   : > { %p1614_p3 = por %p1605_p2, %p131_p1  ;;  %p137_p4 = scmp.ne.s32.totalorder %s1475_s25, %s1471_s24 }
  0x14   : > { %p44_p5 = scmp.ge.s32.totalorder %s2118_s11, 2  ;;  %p1622_p6 = scmp.eq.s32.totalorder %s2067_s9, 7 }
  0x15   : > { %s144_s16 = ssub.s32 %s1491_s29, %s2116_s10  ;;  %s151_s17 = sadd.s32 1, %s1467_s23 }
  0x16   : > { %s2120_s11 = smov (%p44_p5, %s2118_s11), 0  ;;  %p1633_p7 = por %p1622_p6, %p137_p4 }
  0x17   : > { %2089 = sst [smem:[#allocation16_spill]] %s2120_s11  ;;  %p161_p8 = scmp.ne.s32.totalorder %s1467_s23, %s1463_s22 }
  0x18   : > { %s2090_s18 = scalar_select %p1633_p7, 1, 0 }
  0x19   : > { %s116_s19 = ssub.s32 %s1495_s30, %s2120_s11  ;;  %p167_p9 = scmp.ne.s32.totalorder %s1463_s22, %s1459_s21 }
  0x1a   : > { %2091 = sst [smem:[#allocation17_spill]] %s2090_s18  ;;  %p119_p10 = scmp.eq.s32.totalorder %s116_s19, 0 }
  0x1b   : > { %s146_s20 = sor.u32 %s144_s16, %s116_s19  ;;  %p1645_p12 = por %p161_p8, %p1605_p2 }
  0x1c   : > { %p149_p11 = scmp.eq.s32.totalorder %s146_s20, 0  ;;  %p1657_p13 = por %p167_p9, %p1622_p6 }
  0x1d   : > { %s1650_s8 = scalar_select %p119_p10, %s1479_s26, %s121_s12  }
  0x1e   : > { %s1653_s10 = scalar_select %p149_p11, %s1467_s23, %s151_s17  }
  0x1f   : > { %2093 = sst [smem:[#allocation18_spill]] %s1650_s8  ;;  %p1114_p0 = scmp.ge.s32.totalorder %s1499_s7, 1 }
  0x20   : > { %2094 = sst [smem:[#allocation19_spill]] %s1653_s10  ;;  %p263_p1 = scmp.lt.s32.totalorder %s1499_s7, 9 }
  0x21   : > { %s2095_s29 = scalar_select %p1657_p13, 1, 0 }
  0x22   : > { %p264_p4 = pnand %p1114_p0, %p263_p1 }
  0x23   : > { %2096 = sst [smem:[#allocation20_spill]] %s2095_s29  ;;  %s2077_s21 = sand.u32 (!%p264_p4), 1, %s1475_s25  }
  0x24   : > { %267 = sbr.rel (%p264_p4) target bundleno = 749 (0x2ed), region = 32  ;;  %s294_s12 = sand.u32 (!%p264_p4), 1, %s1463_s22  }
  0x25   : > { %s1115_s13 = sshll.u32 (!%p264_p4), %s2077_s21, 5  ;;  %s1116_s15 = sshll.u32 (!%p264_p4), %s294_s12, 5 }
  0x26   : > { %p315_p2 = scmp.lt.s32.totalorder (!%p264_p4), %s1487_s28, 1  ;;  %p323_p5 = scmp.lt.s32.totalorder (!%p264_p4), %s1483_s27, 3 }
  0x27   : > { %s2097_s0 = sld [smem:[#allocation21_spill]] (!%p264_p4)  ;;  %s1680_s29 = scalar_lea.vmem (!%p264_p4), [#allocation3], %s1115_s13 }
  0x28   : > { %s1682_s21 = scalar_lea.vmem (!%p264_p4), [#allocation5], %s1116_s15  ;;  %s1684_s18 = scalar_lea.vmem (!%p264_p4), [#allocation7], %s294_s12 }
  0x29   : > { %s316_s16 = scalar_select %p315_p2, %s1487_s28, 1 }
  0x2a   : > { %s324_s17 = scalar_select %p323_p5, %s1483_s27, 3 }
  0x2b   : > { %s1181_s19 = sshll.u32 %s316_s16, 5  ;;  %p1120_p6 = scmp.ne.s32.totalorder %s1483_s27, 0 }
  0x2c   : > { %s1119_s8 = sshll.u32 %s324_s17, 1 }
  0x2d   : > { %s322_s30 = scalar_lea.vmem %s2097_s0, %s1181_s19  ;;  %s1674_s26 = sadd.s32 %s1119_s8, %s316_s16 }
  0x2e   : > { %336 = sbr.rel (%p1120_p6) target bundleno = 60 (0x3c), region = 36 }
  0x33   : > { %v337_v0 = vld [vmem:[%s322_s30] sm:$0xff]  ;;  %v338_v1 = vld [vmem:[%s322_s30 + $0x8] sm:$0xff]  ;;  %v339_v2 = vld [vmem:[%s322_s30 + $0x10] sm:$0xff]  ;;  %v1501_v4 = vmov 0.0  }
  0x34   : > { %341 = vst [vmem:[#allocation2 + $0x10] sm:$0xff] %v337_v0  ;;  %v340_v3 = vld [vmem:[%s322_s30 + $0x18] sm:$0xff] }
  0x35   : > { %342 = vst [vmem:[#allocation2] sm:$0xff] %v338_v1 }
  0x36   : > { %343 = vst [vmem:[#allocation2 + $0x18] sm:$0xff] %v339_v2 }
  0x37   : > { %344 = vst [vmem:[#allocation2 + $0x8] sm:$0xff] %v340_v3 }
  0x38   : > { %345 = vst [vmem:[%s1680_s29] sm:$0xff] %v1501_v4 }
  0x39   : > { %346 = vst [vmem:[%s1680_s29 + $0x8] sm:$0xff] %v1501_v4 }
  0x3a   : > { %347 = vst [vmem:[%s1680_s29 + $0x10] sm:$0xff] %v1501_v4 }
  0x3b   : > { %348 = vst [vmem:[%s1680_s29 + $0x18] sm:$0xff] %v1501_v4 }
  0x3c PF: > { %s1121_s23 = sshll.u32 %s1483_s27, 5  ;;  %v1703_v8 = vld [vmem:[#allocation2] sm:$0xff]  ;;  %v1722_v12 = vld [vmem:[#allocation2 + $0x10] sm:$0xff]  ;;  %s1122_s30 = sshll.u32 %s1483_s27, 7  ;;  %v1502_v14 = vmov 0   ;;  %vm409_vm0 = vcmask 261120  }
  0x3d   : > { %v1694_v6 = vld [vmem:[#allocation2 + $0x18] sm:$0xff]  ;;  %s354_s11 = scalar_lea.vmem %s2061_s1, %s1121_s23  ;;  %s1731_s15 = scalar_lea.vmem %s2062_s2, %s1122_s30  ;;  %1318 = vset.pattern.permute.xlu1 %v1502_v14  ;;  %1319 = vset.pattern.permute.xlu2 %v1502_v14 }
  0x3e   : > { %v1692_v5 = vld [vmem:[#allocation2 + $0x8] sm:$0xff]  ;;  %v1701_v7 = vld [vmem:[%s354_s11] sm:$0xff]  ;;  %v1716_v10 = vld [vmem:[%s354_s11 + $0x10] sm:$0xff]  ;;  %s1175_s16 = sshll.u32 %s1487_s28, 2  ;;  %s1176_s17 = sshll.u32 %s1483_s27, 3 }
  0x3f   : > { %470 = vmatpush.msra.mxu0 %v1692_v5  ;;  %1183 = vmatpush.msra.mxu2 %v1692_v5  ;;  %v1713_v9 = vld [vmem:[%s354_s11 + $0x8] sm:$0xff]  ;;  %v1719_v11 = vld [vmem:[%s354_s11 + $0x18] sm:$0xff]  ;;  %v361_v13 = vld [vmem:[%s1731_s15] sm:$0xff]  ;;  %s894_s19 = sadd.s32 %s1176_s17, %s1175_s16  ;;  %s1178_s20 = sshll.u32 %s1483_s27, 1 }
  0x40   : > { %1184 = vmatpush.msra.mxu3 %v1692_v5  ;;  %377 = vxpose.xlu0.b32.start [1/4] (short) %v1701_v7, 128  ;;  %v362_v15 = vld [vmem:[%s1731_s15 + $0x8] sm:$0xff]  ;;  %v365_v18 = vld [vmem:[%s1731_s15 + $0x20] sm:$0xff]  ;;  %v367_v20 = vld [vmem:[%s1731_s15 + $0x30] sm:$0xff]  ;;  %s1177_s23 = sshll.u32 %s894_s19, 3  ;;  %s2098_s8 = sadd.s32 4294967295, %s1499_s7  }
  0x41   : > { %471 = vmatpush.msra.mxu0 %v1694_v6  ;;  %1185 = vmatpush.msra.mxu2 %v1694_v6  ;;  %v363_v21 = vld [vmem:[%s1731_s15 + $0x10] sm:$0xff]  ;;  %v370_v23 = vld [vmem:[%s1731_s15 + $0x48] sm:$0xff]  ;;  %v364_v24 = vld [vmem:[%s1731_s15 + $0x18] sm:$0xff]  ;;  %s1922_s10 = sand.u32 1, %s2098_s8   ;;  %s913_s11 = sadd.s32 %s1487_s28, %s1178_s20 }
  0x42   : > { %1186 = vmatpush.msra.mxu3 %v1694_v6  ;;  %525 = vperm.xlu1 %1318, %v361_v13   ;;  %v372_v26 = vld [vmem:[%s1731_s15 + $0x58] sm:$0xff]  ;;  %v374_v28 = vld [vmem:[%s1731_s15 + $0x68] sm:$0xff]  ;;  %v369_v34 = vld [vmem:[%s1731_s15 + $0x40] sm:$0xff]  ;;  %s1182_s30 = sshll.u32 %s1487_s28, 5  ;;  %s896_s13 = scalar_lea.hbm %s2064_s4, %s1177_s23 }
  0x43   : > { %472 = vmatpush.msra.mxu0 %v1703_v8  ;;  %1187 = vmatpush.msra.mxu2 %v1703_v8  ;;  %v366_v29 = vld [vmem:[%s1731_s15 + $0x28] sm:$0xff]  ;;  %v376_v31 = vld [vmem:[%s1731_s15 + $0x78] sm:$0xff]  ;;  %v371_v36 = vld [vmem:[%s1731_s15 + $0x50] sm:$0xff]  ;;  %s914_s19 = scalar_lea.hbm %s2065_s5, %s913_s11  ;;  %s876_s8 = scalar_lea.hbm %s2063_s3, %s1182_s30 }
  0x44   : > { %1188 = vmatpush.msra.mxu3 %v1703_v8  ;;  %535 = vperm.xlu2 %1319, %v363_v21   ;;  %v368_v33 = vld [vmem:[%s1731_s15 + $0x38] sm:$0xff]  ;;  %v373_v38 = vld [vmem:[%s1731_s15 + $0x60] sm:$0xff]  ;;  %v375_v40 = vld [vmem:[%s1731_s15 + $0x70] sm:$0xff]  ;;  %s897_s15 = sshll.u32 %s1682_s21, 4  ;;  %s899_s22 = sshll.u32 %s896_s13, 4  ;;  %s1941_s15 = int_to_ptr.vmem [resolvable:$true] %s897_s15  ;;  %s1948_s22 = int_to_ptr.hbm [resolvable:$true] %s899_s22 }
  0x45   : > { %473 = vmatpush.msra.mxu0 %v1722_v12  ;;  %1189 = vmatpush.msra.mxu2 %v1722_v12  ;;  %s916_s0 = sshll.u32 %s1684_s18, 4  ;;  %s1944_s23 = sshll.u32 %s914_s19, 4  ;;  %s1950_s0 = int_to_ptr.vmem [resolvable:$true] %s916_s0  ;;  %s919_s23 = int_to_ptr.hbm [resolvable:$true] %s1944_s23 }
  0x46   : > { %1190 = vmatpush.msra.mxu3 %v1722_v12  ;;  %s877_s27 = sshll.u32 %s1680_s29, 4  ;;  %s879_s12 = sshll.u32 %s876_s8, 4  ;;  %s1955_s27 = int_to_ptr.vmem [resolvable:$true] %s877_s27  ;;  %s1957_s12 = int_to_ptr.hbm [resolvable:$true] %s879_s12 }
  0x47   : > { %s1335_s11 = sshra.s32 %s1948_s22, 4  ;;  %s1341_s17 = scalar_lea.hbm %s2064_s4, 256  ;;  %s1336_s11 = int_to_ptr.hbm [resolvable:$true] %s1335_s11 }
  0x48   : > { %378 = vxpose.xlu0.b32.cont [2/4] (short) %v1713_v9, 128  ;;  %s1337_s30 = scalar_lea.hbm %s1336_s11, 32  ;;  %p1342_p11 = scmp.lt.s32.totalorder %s1336_s11, %s2064_s4 }
  0x49   : > { %p1338_p8 = scmp.ne.s32.totalorder %s1336_s11, %s1337_s30  ;;  %p1343_p0 = scmp.lt.s32.totalorder %s1341_s17, %s1337_s30 }
  0x4a   : > { %530 = vperm.xlu1 %1318, %v362_v15  }
  0x4b   : > { %p1339_p9 = pnand %p1338_p8, %p1645_p12  ;;  %p1344_p1 = por %p1343_p0, %p1342_p11 }
  0x4c   : > { %540 = vperm.xlu2 %1319, %v364_v24  }
  0x4d   : > { %p1340_p10 = pneg %p1339_p9 }
  0x4f   : > { %p1345_p4 = pnand %p1344_p1, %p1340_p10 }
  0x50   : > { %379 = vxpose.xlu0.b32.cont [3/4] (short) %v1716_v10, 128 }
  0x52   : > { %545 = vperm.xlu1 %1318, %v365_v18  }
  0x54   : > { %550 = vperm.xlu2 %1319, %v366_v29  }
  0x58   : > { %380 = vxpose.xlu0.b32.end [4/4] (short) %v1719_v11, 128 }
  0x5a   : > { %555 = vperm.xlu1 %1318, %v367_v20  }
  0x5c   : > { %560 = vperm.xlu2 %1319, %v368_v33  }
  0x62   : > { %570 = vperm.xlu1 %1318, %v370_v23  }
  0x64   : > { %575 = vperm.xlu2 %1319, %v371_v36  }
  0x6a   : > { %580 = vperm.xlu1 %1318, %v372_v26  }
  0x6c   : > { %585 = vperm.xlu2 %1319, %v373_v38  }
  0x72   : > { %590 = vperm.xlu1 %1318, %v374_v28  }
  0x74   : > { %595 = vperm.xlu2 %1319, %v375_v40  }
  0x7a   : > { %600 = vperm.xlu1 %1318, %v376_v31  }
  0x9e   : > { %v536_v49 = vpop.permute.xlu2 %535 }
  0xa6   : > { %v541_v53 = vpop.permute.xlu2 %540 }
  0xae   : > { %v551_v57 = vpop.permute.xlu2 %550 }
  0xb4   : > { %v526_v46 = vpop.permute.xlu1 %525 }
  0xb6   : > { %v561_v59 = vpop.permute.xlu2 %560 }
  0xbc   : > { %v531_v48 = vpop.permute.xlu1 %530 }
  0xbe   : > { %v576_v0 = vpop.permute.xlu2 %575 }
  0xbf   : > { %1320 = vset.pattern.permute.xlu0 %v1502_v14 }
  0xc4   : > { %v546_v51 = vpop.permute.xlu1 %545 }
  0xc6   : > { %v586_v13 = vpop.permute.xlu2 %585 }
  0xcc   : > { %v556_v55 = vpop.permute.xlu1 %555 }
  0xd4   : > { %v571_v61 = vpop.permute.xlu1 %570 }
  0xdc   : > { %v581_v2 = vpop.permute.xlu1 %580 }
  0xe4   : > { %v393_v16 = vpop.trf.xlu0  ;;  %v591_v15 = vpop.permute.xlu1 %590 }
  0xe5   : > { %1123 = vmatmul.msk.f32.vlgmr.msra.gmra.mxu0 %vm409_vm0, %v393_v16 }
  0xec   : > { %v394_v17 = vpop.trf.xlu0  ;;  %v601_v40 = vpop.permute.xlu1 %600 }
  0xed   : > { %1124 = vmatmul.msk.f32.gmra.mxu0 %vm409_vm0, %v394_v17 }
  0xf4   : > { %v395_v19 = vpop.trf.xlu0 }
  0xf5   : > { %1125 = vmatmul.msk.f32.gmra.mxu0 %vm409_vm0, %v395_v19 }
  0xfc   : > { %v396_v22 = vpop.trf.xlu0 }
  0xfd   : > { %1126 = vmatmul.msk.f32.gmra.mxu0 %vm409_vm0, %v396_v22 }
 0x104   : > { %v397_v25 = vpop.trf.xlu0 }
 0x105   : > { %1127 = vmatmul.msk.f32.gmra.mxu0 %vm409_vm0, %v397_v25 }
 0x10c   : > { %v398_v27 = vpop.trf.xlu0 }
 0x10d   : > { %1128 = vmatmul.msk.f32.gmra.mxu0 %vm409_vm0, %v398_v27 }
 0x114   : > { %v399_v30 = vpop.trf.xlu0 }
 0x115   : > { %1129 = vmatmul.msk.f32.vlgmr.msra.gmra.mxu2 %vm409_vm0, %v399_v30 }
 0x11c   : > { %v400_v32 = vpop.trf.xlu0 }
 0x11d   : > { %1130 = vmatmul.msk.f32.gmra.mxu2 %vm409_vm0, %v400_v32 }
 0x124   : > { %v401_v35 = vpop.trf.xlu0 }
 0x125   : > { %1131 = vmatmul.msk.f32.gmra.mxu2 %vm409_vm0, %v401_v35  ;;  %v596_v35 = vpop.permute.xlu2 %595 }
 0x126   : > { %565 = vperm.xlu0 %1320, %v369_v34  }
 0x12c   : > { %v402_v37 = vpop.trf.xlu0 }
 0x12d   : > { %1132 = vmatmul.msk.f32.gmra.mxu2 %vm409_vm0, %v402_v37 }
 0x134   : > { %v403_v39 = vpop.trf.xlu0 }
 0x135   : > { %1133 = vmatmul.msk.f32.gmra.mxu2 %vm409_vm0, %v403_v39 }
 0x13c   : > { %v404_v41 = vpop.trf.xlu0 }
 0x13d   : > { %1134 = vmatmul.msk.f32.gmra.mxu2 %vm409_vm0, %v404_v41 }
 0x144   : > { %v405_v42 = vpop.trf.xlu0 }
 0x145   : > { %1135 = vmatmul.msk.f32.vlgmr.msra.gmra.mxu3 %vm409_vm0, %v405_v42 }
 0x14c   : > { %v406_v43 = vpop.trf.xlu0 }
 0x14d   : > { %1136 = vmatmul.msk.f32.gmra.mxu3 %vm409_vm0, %v406_v43 }
 0x154   : > { %v407_v44 = vpop.trf.xlu0 }
 0x155   : > { %1137 = vmatmul.msk.f32.gmra.mxu3 %vm409_vm0, %v407_v44 }
 0x15c   : > { %v408_v45 = vpop.trf.xlu0 }
 0x15d   : > { %1138 = vmatmul.msk.f32.gmra.mxu3 %vm409_vm0, %v408_v45 }
 0x162   : > { %v475_v47 = vpop.f32.mrf.mxu0 }
 0x163   : > { %v1777_v25 = vsub.f32 %v475_v47, %v526_v46 }
 0x16a   : > { %v478_v52 = vpop.f32.mrf.mxu0 }
 0x16b   : > { %v1771_v22 = vsub.f32 %v478_v52, %v531_v48 }
 0x172   : > { %v481_v56 = vpop.f32.mrf.mxu0 }
 0x173   : > { %v1779_v26 = vsub.f32 %v481_v56, %v536_v49 }
 0x17a   : > { %v484_v60 = vpop.f32.mrf.mxu0 }
 0x17b   : > { %v1781_v27 = vsub.f32 %v484_v60, %v541_v53  ;;  %v619_v53 = vlaneseq }
 0x17d   : > { %v1810_v56 = vshrl.u32 %v619_v53, 7 }
 0x182   : > { %v487_v1 = vpop.f32.mrf.mxu0 }
 0x183   : > { %v1767_v19 = vsub.f32 %v487_v1, %v546_v51  ;;  %v1828_v1 = vadd.s32 48, %v1810_v56 }
 0x185   : > { %v636_v33 = vmax.f32 %v1777_v25, %v1767_v19 }
 0x18a   : > { %v490_v14 = vpop.f32.mrf.mxu0 }
 0x18b   : > { %v1765_v17 = vsub.f32 %v490_v14, %v551_v57  ;;  %v1840_v14 = vadd.s32 80, %v1810_v56 }
 0x18d   : > { %v637_v29 = vmax.f32 %v1771_v22, %v1765_v17 }
 0x198   : > { %v493_v50 = vpop.f32.mrf.mxu2  ;;  %v566_v18 = vpop.permute.xlu0 %565 }
 0x199   : > { %v1769_v20 = vsub.f32 %v493_v50, %v556_v55 }
 0x19b   : > { %v638_v34 = vmax.f32 %v1779_v26, %v1769_v20 }
 0x1a0   : > { %v496_v54 = vpop.f32.mrf.mxu2 }
 0x1a1   : > { %v1773_v23 = vsub.f32 %v496_v54, %v561_v59  ;;  %v1813_v59 = vadd.s32 8, %v1810_v56 }
 0x1a3   : > { %v639_v36 = vmax.f32 %v1781_v27, %v1773_v23 }
 0x1a8   : > { %v499_v58 = vpop.f32.mrf.mxu2 }
 0x1a9   : > { %v1783_v28 = vsub.f32 %v499_v58, %v566_v18  ;;  %v1849_v18 = vadd.s32 104, %v1810_v56 }
 0x1ab   : > { %v640_v41 = vmax.f32 %v636_v33, %v1783_v28 }
 0x1b0   : > { %v502_v62 = vpop.f32.mrf.mxu2 }
 0x1b1   : > { %v1775_v24 = vsub.f32 %v502_v62, %v571_v61  ;;  %v1816_v61 = vadd.s32 16, %v1810_v56  ;;  %v1819_v62 = vadd.s32 24, %v1810_v56 }
 0x1b3   : > { %v641_v37 = vmax.f32 %v637_v29, %v1775_v24  ;;  %v1855_v29 = vadd.s32 120, %v1810_v56 }
 0x1b8   : > { %v505_v3 = vpop.f32.mrf.mxu2 }
 0x1b9   : > { %v1787_v30 = vsub.f32 %v505_v3, %v576_v0  ;;  %v1825_v0 = vadd.s32 40, %v1810_v56  ;;  %v1834_v3 = vadd.s32 64, %v1810_v56 }
 0x1bb   : > { %v642_v43 = vmax.f32 %v638_v34, %v1787_v30 }
 0x1c0   : > { %v508_v21 = vpop.f32.mrf.mxu2 }
 0x1c1   : > { %v1789_v31 = vsub.f32 %v508_v21, %v581_v2  ;;  %v1831_v2 = vadd.s32 56, %v1810_v56  ;;  %v1852_v21 = vadd.s32 112, %v1810_v56 }
 0x1c3   : > { %v643_v44 = vmax.f32 %v639_v36, %v1789_v31 }
 0x1c8   : > { %v511_v63 = vpop.f32.mrf.mxu3 }
 0x1c9   : > { %v1800_v38 = vsub.f32 %v511_v63, %v586_v13  ;;  %v1822_v63 = vadd.s32 32, %v1810_v56  ;;  %v1837_v13 = vadd.s32 72, %v1810_v56 }
 0x1cb   : > { %v644_v47 = vmax.f32 %v640_v41, %v1800_v38 }
 0x1d0   : > { %v514_v4 = vpop.f32.mrf.mxu3 }
 0x1d1   : > { %v1791_v32 = vsub.f32 %v514_v4, %v591_v15  ;;  %v1843_v15 = vadd.s32 88, %v1810_v56 }
 0x1d3   : > { %v645_v45 = vmax.f32 %v641_v37, %v1791_v32 }
 0x1d5   : > { %v648_v50 = vmax.f32 %v644_v47, %v645_v45 }
 0x1d8   : > { %v517_v16 = vpop.f32.mrf.mxu3 }
 0x1d9   : > { %v1802_v39 = vsub.f32 %v517_v16, %v596_v35  ;;  %v1846_v16 = vadd.s32 96, %v1810_v56 }
 0x1db   : > { %v646_v48 = vmax.f32 %v642_v43, %v1802_v39 }
 0x1e0   : > { %v520_v42 = vpop.f32.mrf.mxu3 }
 0x1e1   : > { %v618_v46 = vsub.f32 %v520_v42, %v601_v40 }
 0x1e3   : > { %v647_v49 = vmax.f32 %v643_v44, %v618_v46 }
 0x1e5   : > { %v649_v51 = vmax.f32 %v646_v48, %v647_v49 }
 0x1e7   : > { %v650_v52 = vmax.f32 %v648_v50, %v649_v51 }
 0x1e9   : > { %v651_v54 = vrot.slane %v650_v52, 4 }
 0x1eb   : > { %v652_v55 = vmax.f32 %v650_v52, %v651_v54 }
 0x1ed   : > { %v653_v57 = vrot.slane %v652_v55, 2 }
 0x1ef   : > { %v654_v58 = vmax.f32 %v652_v55, %v653_v57 }
 0x1f1   : > { %v655_v60 = vrot.slane %v654_v58, 1 }
 0x1f3   : > { %v656_v4 = vmax.f32 %v654_v58, %v655_v60  ;;  %v1503_v58 = vmov 1.0  }
 0x1f5   : > { %vm672_vm1 = vcmp.ge.f32.partialorder %v618_v46, %v656_v4  ;;  %vm657_vm2 = vcmp.ge.f32.partialorder %v1777_v25, %v656_v4  ;;  %vm658_vm3 = vcmp.ge.f32.partialorder %v1771_v22, %v656_v4  ;;  %vm659_vm4 = vcmp.ge.f32.partialorder %v1779_v26, %v656_v4 }
 0x1f6   : > { %vm660_vm5 = vcmp.ge.f32.partialorder %v1781_v27, %v656_v4  ;;  %vm661_vm6 = vcmp.ge.f32.partialorder %v1767_v19, %v656_v4  ;;  %vm662_vm7 = vcmp.ge.f32.partialorder %v1765_v17, %v656_v4  ;;  %vm663_vm8 = vcmp.ge.f32.partialorder %v1769_v20, %v656_v4 }
 0x1f7   : > { %vm664_vm9 = vcmp.ge.f32.partialorder %v1773_v23, %v656_v4  ;;  %vm665_vm10 = vcmp.ge.f32.partialorder %v1783_v28, %v656_v4  ;;  %vm666_vm11 = vcmp.ge.f32.partialorder %v1775_v24, %v656_v4  ;;  %vm667_vm12 = vcmp.ge.f32.partialorder %v1787_v30, %v656_v4 }
 0x1f8   : > { %vm668_vm13 = vcmp.ge.f32.partialorder %v1789_v31, %v656_v4  ;;  %vm669_vm14 = vcmp.ge.f32.partialorder %v1800_v38, %v656_v4  ;;  %vm670_vm15 = vcmp.ge.f32.partialorder %v1791_v32, %v656_v4  ;;  %vm671_vm0 = vcmp.ge.f32.partialorder %v1802_v39, %v656_v4 }
 0x1f9   : > { %v673_v17 = vsel %vm657_vm2, %v1810_v56, 128  ;;  %v674_v19 = vsel %vm658_vm3, %v1813_v59, 128  ;;  %v675_v20 = vsel %vm659_vm4, %v1816_v61, 128  ;;  %v676_v22 = vsel %vm660_vm5, %v1819_v62, 128 }
 0x1fa   : > { %v677_v23 = vsel %vm661_vm6, %v1822_v63, 128  ;;  %v678_v24 = vsel %vm662_vm7, %v1825_v0, 128  ;;  %v679_v25 = vsel %vm663_vm8, %v1828_v1, 128  ;;  %v680_v26 = vsel %vm664_vm9, %v1831_v2, 128 }
 0x1fb   : > { %v681_v27 = vsel %vm665_vm10, %v1834_v3, 128  ;;  %v682_v28 = vsel %vm666_vm11, %v1837_v13, 128  ;;  %v683_v30 = vsel %vm667_vm12, %v1840_v14, 128  ;;  %v684_v31 = vsel %vm668_vm13, %v1843_v15, 128 }
 0x1fc   : > { %v685_v32 = vsel %vm669_vm14, %v1846_v16, 128  ;;  %v686_v33 = vsel %vm670_vm15, %v1849_v18, 128  ;;  %v687_v34 = vsel %vm671_vm0, %v1852_v21, 128  ;;  %v688_v35 = vsel %vm672_vm1, %v1855_v29, 128 }
 0x1fd   : > { %vm689_vm2 = vcmp.lt.s32.totalorder %v673_v17, %v677_v23  ;;  %vm691_vm3 = vcmp.lt.s32.totalorder %v674_v19, %v678_v24  ;;  %vm693_vm4 = vcmp.lt.s32.totalorder %v675_v20, %v679_v25  ;;  %vm695_vm5 = vcmp.lt.s32.totalorder %v676_v22, %v680_v26 }
 0x1fe   : > { %v690_v36 = vsel %vm689_vm2, %v673_v17, %v677_v23  ;;  %v692_v37 = vsel %vm691_vm3, %v674_v19, %v678_v24  ;;  %v694_v38 = vsel %vm693_vm4, %v675_v20, %v679_v25  ;;  %v696_v39 = vsel %vm695_vm5, %v676_v22, %v680_v26 }
 0x1ff   : > { %vm697_vm6 = vcmp.lt.s32.totalorder %v690_v36, %v681_v27  ;;  %vm699_vm7 = vcmp.lt.s32.totalorder %v692_v37, %v682_v28  ;;  %vm701_vm8 = vcmp.lt.s32.totalorder %v694_v38, %v683_v30  ;;  %vm703_vm9 = vcmp.lt.s32.totalorder %v696_v39, %v684_v31 }
 0x200   : > { %v698_v40 = vsel %vm697_vm6, %v690_v36, %v681_v27  ;;  %v700_v41 = vsel %vm699_vm7, %v692_v37, %v682_v28  ;;  %v702_v42 = vsel %vm701_vm8, %v694_v38, %v683_v30  ;;  %v704_v43 = vsel %vm703_vm9, %v696_v39, %v684_v31 }
 0x201   : > { %vm705_vm10 = vcmp.lt.s32.totalorder %v698_v40, %v685_v32  ;;  %vm707_vm11 = vcmp.lt.s32.totalorder %v700_v41, %v686_v33  ;;  %vm709_vm12 = vcmp.lt.s32.totalorder %v702_v42, %v687_v34  ;;  %vm711_vm1 = vcmp.lt.s32.totalorder %v704_v43, %v688_v35 }
 0x202   : > { %v706_v44 = vsel %vm705_vm10, %v698_v40, %v685_v32  ;;  %v708_v45 = vsel %vm707_vm11, %v700_v41, %v686_v33  ;;  %v710_v46 = vsel %vm709_vm12, %v702_v42, %v687_v34  ;;  %v712_v47 = vsel %vm711_vm1, %v704_v43, %v688_v35 }
 0x203   : > { %vm713_vm13 = vcmp.lt.s32.totalorder %v706_v44, %v708_v45  ;;  %vm715_vm14 = vcmp.lt.s32.totalorder %v710_v46, %v712_v47 }
 0x204   : > { %v714_v48 = vsel %vm713_vm13, %v706_v44, %v708_v45  ;;  %v716_v49 = vsel %vm715_vm14, %v710_v46, %v712_v47 }
 0x205   : > { %vm717_vm15 = vcmp.lt.s32.totalorder %v714_v48, %v716_v49 }
 0x206   : > { %v718_v50 = vsel %vm717_vm15, %v714_v48, %v716_v49 }
 0x207   : > { %v719_v51 = vrot.slane %v718_v50, 4 }
 0x209   : > { %vm720_vm0 = vcmp.lt.s32.totalorder %v718_v50, %v719_v51 }
 0x20a   : > { %v721_v52 = vsel %vm720_vm0, %v718_v50, %v719_v51 }
 0x20b   : > { %v722_v53 = vrot.slane %v721_v52, 2 }
 0x20d   : > { %vm723_vm2 = vcmp.lt.s32.totalorder %v721_v52, %v722_v53 }
 0x20e   : > { %v724_v54 = vsel %vm723_vm2, %v721_v52, %v722_v53 }
 0x20f   : > { %v725_v55 = vrot.slane %v724_v54, 1 }
 0x211   : > { %vm726_vm3 = vcmp.lt.s32.totalorder %v724_v54, %v725_v55 }
 0x212   : > { %v727_v57 = vsel %vm726_vm3, %v724_v54, %v725_v55 }
 0x213   : > { %vm743_vm4 = vcmp.eq.s32.totalorder %v1855_v29, %v727_v57  ;;  %829 = vst [vmem:[%s1684_s18] sm:$0x1] %v727_v57  ;;  %vm742_vm5 = vcmp.eq.s32.totalorder %v1852_v21, %v727_v57  ;;  %vm741_vm6 = vcmp.eq.s32.totalorder %v1849_v18, %v727_v57  ;;  %vm740_vm7 = vcmp.eq.s32.totalorder %v1846_v16, %v727_v57  ;;  %s850_s18 = scalar_lea.sflag [#allocation6], %s1922_s10 }
 0x214   : > { %1155 = vmatpush.msk.msra.mxu1 %vm743_vm4, %v1503_v58  ;;  %1191 = vmatpush.msk.msrb.mxu3 %vm743_vm4, %v1503_v58  ;;  %vm739_vm8 = vcmp.eq.s32.totalorder %v1843_v15, %v727_v57  ;;  %vm738_vm9 = vcmp.eq.s32.totalorder %v1840_v14, %v727_v57  ;;  %vm737_vm10 = vcmp.eq.s32.totalorder %v1837_v13, %v727_v57 }
 0x215   : > { %vm736_vm11 = vcmp.eq.s32.totalorder %v1834_v3, %v727_v57  ;;  %vm735_vm12 = vcmp.eq.s32.totalorder %v1831_v2, %v727_v57  ;;  %vm734_vm1 = vcmp.eq.s32.totalorder %v1828_v1, %v727_v57  ;;  %vm733_vm13 = vcmp.eq.s32.totalorder %v1825_v0, %v727_v57 }
 0x216   : > { %1156 = vmatpush.msk.msra.mxu1 %vm742_vm5, %v1503_v58  ;;  %1192 = vmatpush.msk.msrb.mxu3 %vm742_vm5, %v1503_v58  ;;  %vm732_vm14 = vcmp.eq.s32.totalorder %v1822_v63, %v727_v57  ;;  %vm731_vm15 = vcmp.eq.s32.totalorder %v1819_v62, %v727_v57  ;;  %vm730_vm0 = vcmp.eq.s32.totalorder %v1816_v61, %v727_v57 }
 0x217   : > { %vm729_vm2 = vcmp.eq.s32.totalorder %v1813_v59, %v727_v57  ;;  %vm728_vm3 = vcmp.eq.s32.totalorder %v1810_v56, %v727_v57  ;;  %v809_v59 = vld [vmem:[%s1680_s29] sm:$0xff] }
 0x218   : > { %1157 = vmatpush.msk.msra.mxu1 %vm741_vm6, %v1503_v58  ;;  %1193 = vmatpush.msk.msrb.mxu3 %vm741_vm6, %v1503_v58 }
 0x21a   : > { %1158 = vmatpush.msk.msra.mxu1 %vm740_vm7, %v1503_v58  ;;  %1194 = vmatpush.msk.msrb.mxu3 %vm740_vm7, %v1503_v58 }
 0x21c   : > { %1159 = vmatpush.msk.msra.mxu1 %vm739_vm8, %v1503_v58  ;;  %1195 = vmatpush.msk.msrb.mxu3 %vm739_vm8, %v1503_v58 }
 0x21e   : > { %1160 = vmatpush.msk.msra.mxu1 %vm738_vm9, %v1503_v58  ;;  %1196 = vmatpush.msk.msrb.mxu3 %vm738_vm9, %v1503_v58 }
 0x220   : > { %1161 = vmatpush.msk.msra.mxu1 %vm737_vm10, %v1503_v58  ;;  %1197 = vmatpush.msk.msrb.mxu3 %vm737_vm10, %v1503_v58 }
 0x222   : > { %1162 = vmatpush.msk.msra.mxu1 %vm736_vm11, %v1503_v58  ;;  %1198 = vmatpush.msk.msrb.mxu3 %vm736_vm11, %v1503_v58 }
 0x224   : > { %1163 = vmatpush.msk.msra.mxu1 %vm735_vm12, %v1503_v58  ;;  %1199 = vmatpush.msk.msrb.mxu3 %vm735_vm12, %v1503_v58 }
 0x226   : > { %1164 = vmatpush.msk.msra.mxu1 %vm734_vm1, %v1503_v58  ;;  %1200 = vmatpush.msk.msrb.mxu3 %vm734_vm1, %v1503_v58 }
 0x228   : > { %1165 = vmatpush.msk.msra.mxu1 %vm733_vm13, %v1503_v58  ;;  %1201 = vmatpush.msk.msrb.mxu3 %vm733_vm13, %v1503_v58 }
 0x22a   : > { %1166 = vmatpush.msk.msra.mxu1 %vm732_vm14, %v1503_v58  ;;  %1202 = vmatpush.msk.msrb.mxu3 %vm732_vm14, %v1503_v58 }
 0x22c   : > { %1167 = vmatpush.msk.msra.mxu1 %vm731_vm15, %v1503_v58  ;;  %1203 = vmatpush.msk.msrb.mxu3 %vm731_vm15, %v1503_v58 }
 0x22e   : > { %1168 = vmatpush.msk.msra.mxu1 %vm730_vm0, %v1503_v58  ;;  %1204 = vmatpush.msk.msrb.mxu3 %vm730_vm0, %v1503_v58 }
 0x230   : > { %1169 = vmatpush.msk.msra.mxu1 %vm729_vm2, %v1503_v58  ;;  %1205 = vmatpush.msk.msrb.mxu3 %vm729_vm2, %v1503_v58 }
 0x232   : > { %1170 = vmatpush.msk.msra.mxu1 %vm728_vm3, %v1503_v58  ;;  %1206 = vmatpush.msk.msrb.mxu3 %vm728_vm3, %v1503_v58 }
 0x233   : > { %792 = vmatmul.f32.vlgmr.msra.gmra.mxu1 %v1701_v7  ;;  %801 = vmatmul.f32.vlgmr.msrb.gmra.mxu3 %v1719_v11  ;;  %v812_v7 = vld [vmem:[%s1680_s29 + $0x18] sm:$0xff] }
 0x23b   : > { %795 = vmatmul.f32.gmra.mxu1 %v1713_v9  ;;  %v810_v9 = vld [vmem:[%s1680_s29 + $0x8] sm:$0xff] }
 0x243   : > { %798 = vmatmul.f32.gmra.mxu1 %v1716_v10 }
 0x2b0   : > { %v793_v60 = vpop.f32.mrf.mxu1 }
 0x2b1   : > { %v805_v56 = vsub.f32 %v1722_v12, %v793_v60  ;;  %v813_v61 = vadd.f32 %v809_v59, %v793_v60  ;;  %825 = vst [vmem:[%s1682_s21] sm:$0xff] %v793_v60 }
 0x2b3   : > { %817 = vst [vmem:[%s1680_s29] sm:$0xff] %v813_v61  ;;  %v830_v2 = vmul.f32 %v805_v56, %v805_v56 }
 0x2b4   : > { %821 = vst [vmem:[#allocation2 + $0x10] sm:$0xff] %v805_v56 }
 0x2b6   : > { %v802_v10 = vpop.f32.mrf.mxu3 }
 0x2b7   : > { %v816_v11 = vadd.f32 %v812_v7, %v802_v10  ;;  %828 = vst [vmem:[%s1682_s21 + $0x18] sm:$0xff] %v802_v10  ;;  %v808_v0 = vsub.f32 %v1692_v5, %v802_v10  ;;  %v811_v5 = vld [vmem:[%s1680_s29 + $0x10] sm:$0xff] }
 0x2b8   : > { %v796_v12 = vpop.f32.mrf.mxu1 }
 0x2b9   : > { %v806_v62 = vsub.f32 %v1703_v8, %v796_v12  ;;  %v814_v63 = vadd.f32 %v810_v9, %v796_v12  ;;  %826 = vst [vmem:[%s1682_s21 + $0x8] sm:$0xff] %v796_v12 }
 0x2ba   : > { %820 = vst [vmem:[%s1680_s29 + $0x18] sm:$0xff] %v816_v11 }
 0x2bb   : > { %818 = vst [vmem:[%s1680_s29 + $0x8] sm:$0xff] %v814_v63  ;;  %v831_v8 = vmul.f32 %v806_v62, %v806_v62 }
 0x2bc   : > { %822 = vst [vmem:[#allocation2] sm:$0xff] %v806_v62 }
 0x2bd   : > { %824 = vst [vmem:[#allocation2 + $0x8] sm:$0xff] %v808_v0 }
 0x2c0   : > { %v799_v1 = vpop.f32.mrf.mxu1 }
 0x2c1   : > { %v807_v3 = vsub.f32 %v1694_v6, %v799_v1  ;;  %v815_v4 = vadd.f32 %v811_v5, %v799_v1  ;;  %827 = vst [vmem:[%s1682_s21 + $0x10] sm:$0xff] %v799_v1 }
 0x2c2   : > { %1348 = shalt.err (!%p1345_p4)
}
 0x2c3   : > { %s1504_s21 = smov 128   ;;  %s1505_s20 = smov 8   ;;  %v834_v6 = vadd.f32 %v831_v8, %v830_v2  ;;  %819 = vst [vmem:[%s1680_s29 + $0x10] sm:$0xff] %v815_v4  ;;  %v832_v13 = vmul.f32 %v807_v3, %v807_v3  ;;  %v833_v14 = vmul.f32 %v808_v0, %v808_v0 }
 0x2c4   : > { %1208 = dma.vmem_to_hbm [thread:$0]  (%p1645_p12), %s1941_s15, 512, %s1948_s22, %s850_s18, %s1504_s21, %s1504_s21, %s1505_s20  }
 0x2c5   : > { %s1363_s8 = sshra.s32 %s919_s23, 4  ;;  %s1369_s16 = scalar_lea.hbm %s2065_s5, 8  ;;  %s1364_s8 = int_to_ptr.hbm [resolvable:$true] %s1363_s8 }
 0x2c6   : > { %s1365_s11 = scalar_lea.hbm %s1364_s8, 1  ;;  %p1370_p8 = scmp.lt.s32.totalorder %s1364_s8, %s2065_s5 }
 0x2c7   : > { %p1366_p2 = scmp.ne.s32.totalorder %s1364_s8, %s1365_s11  ;;  %p1371_p9 = scmp.lt.s32.totalorder %s1369_s16, %s1365_s11 }
 0x2c9   : > { %p1367_p5 = pnand %p1366_p2, %p1645_p12  ;;  %p1372_p10 = por %p1371_p9, %p1370_p8 }
 0x2cb   : > { %p1368_p6 = pneg %p1367_p5 }
 0x2cd   : > { %p1373_p11 = pnand %p1372_p10, %p1368_p6 }
 0x2cf   : > { %1376 = shalt.err (!%p1373_p11)
}
 0x2d0   : > { %1209 = dma.vmem_to_hbm [thread:$0]  (%p1645_p12), %s1950_s0, 16, %s919_s23, %s850_s18   ;;  %823 = vst [vmem:[#allocation2 + $0x18] sm:$0xff] %v807_v3 }
 0x2d1   : > { %s2099_s22 = sand.u32 1, %s1475_s25   ;;  %s1391_s15 = sshra.s32 %s1957_s12, 4  ;;  %s1392_s15 = int_to_ptr.hbm [resolvable:$true] %s1391_s15 }
 0x2d2   : > { %s845_s29 = scalar_lea.sflag [#allocation4], %s2099_s22  ;;  %s1393_s28 = scalar_lea.hbm %s1392_s15, 32 }
 0x2d3   : > { %p1394_p0 = scmp.ne.s32.totalorder %s1392_s15, %s1393_s28  ;;  %s1397_s10 = scalar_lea.hbm %s2063_s3, 64 }
 0x2d4   : > { %p1398_p2 = scmp.lt.s32.totalorder %s1392_s15, %s2063_s3  ;;  %p1399_p5 = scmp.lt.s32.totalorder %s1397_s10, %s1393_s28 }
 0x2d5   : > { %p1395_p1 = pnand %p1394_p0, %p1614_p3 }
 0x2d6   : > { %p1400_p12 = por %p1399_p5, %p1398_p2 }
 0x2d7   : > { %p1396_p4 = pneg %p1395_p1 }
 0x2d9   : > { %p1401_p6 = pnand %p1400_p12, %p1396_p4 }
 0x2db   : > { %1404 = shalt.err (!%p1401_p6)
}
 0x2dc   : > { %1207 = dma.vmem_to_hbm [thread:$0]  (%p1614_p3), %s1955_s27, 512, %s1957_s12, %s845_s29, %s1504_s21, %s1504_s21, %s1505_s20   ;;  %v835_v15 = vadd.f32 %v834_v6, %v832_v13 }
 0x2dd   : > { %s2100_s18 = scalar_lea.vmem %s2066_s6, %s1674_s26 }
 0x2de   : > { %v836_v16 = vadd.f32 %v835_v15, %v833_v14 }
 0x2e0   : > { %v837_v18 = vrot.slane %v836_v16, 4 }
 0x2e2   : > { %v838_v21 = vadd.f32 %v837_v18, %v836_v16 }
 0x2e4   : > { %v839_v29 = vrot.slane %v838_v21, 2 }
 0x2e6   : > { %v840_v17 = vadd.f32 %v839_v29, %v838_v21 }
 0x2e8   : > { %v841_v19 = vrot.slane %v840_v17, 1 }
 0x2ea   : > { %v842_v20 = vadd.f32 %v841_v19, %v840_v17 }
 0x2ec   : > { %843 = vst [vmem:[%s2100_s18] sm:$0x1] %v842_v20 }
 0x2ed PF: > { %p1223_p8 = scmp.ge.s32.totalorder %s1499_s7, 2  ;;  %s933_s13 = sand.u32 1, %s1471_s24  }
 0x2ee   : > { %s934_s27 = scalar_lea.sflag [#allocation4], %s933_s13 }
 0x2ef   : > { %p1214_p3 = pnand %p1223_p8, %p1633_p7 }
 0x2f1   : > { %p1215_p9 = pneg %p1214_p3 }
 0x2f3   : > { %1450 = dma.done.wait (%p1215_p9), %s934_s27, 512  }
 0x2f4   : > { %1452 = vsyncadd (%p1215_p9), %s934_s27, 4294966784  ;;  %s2102_s12 = sadd.s32 4294967294, %s1499_s7   ;;  %p1217_p10 = pnand %p1223_p8, %p1657_p13 }
 0x2f5   : > { %s943_s20 = sand.u32 1, %s2102_s12  }
 0x2f6   : > { %p1218_p11 = pneg %p1217_p10  ;;  %s944_s26 = scalar_lea.sflag [#allocation6], %s943_s20 }
 0x2f8   : > { %1454 = dma.done.wait (%p1218_p11), %s944_s26, 528  }
 0x2f9   : > { %1456 = vsyncadd (%p1218_p11), %s944_s26, 4294966768  ;;  %s23_s7 = sadd.s32 1, %s1499_s7   ;;  %s2104_s21 = sld [smem:[#allocation10_spill]] }
 0x2fa   : > { %p20_p0 = scmp.ge.s32.totalorder %s23_s7, 10   ;;  %s2105_s22 = sld [smem:[#allocation11_spill]] }
 0x2fb   : > { %s2106_s23 = sld [smem:[#allocation19_spill]]  ;;  %s2113_s24 = smov %s1475_s25 }
 0x2fc   : > { %s2107_s16 = sld [smem:[#allocation12_spill]] }
 0x2fd   : > { %s2108_s26 = sld [smem:[#allocation18_spill]] }
 0x2fe   : > { %s2109_s27 = sld [smem:[#allocation13_spill]]  ;;  %22 = sbr.rel (!%p20_p0) target bundleno = 11 (0xb), region = 117 }
 0x2ff   : > { %s2110_s28 = sld [smem:[#allocation14_spill]] }
 0x300   : > { %s2111_s29 = sld [smem:[#allocation15_spill]] }
 0x301   : > { %s2112_s30 = sld [smem:[#allocation16_spill]] }
 0x302   : > { %s2114_s25 = smov %s2107_s16 }
 0x303   :  { %972 = vsyncpa [#allocation4], 1 }
 0x304   :  { %974 = vsyncpa [#allocation4 + $0x1], 1 }
 0x305   :  { %975 = vsyncpa [#allocation6], 1 }
 0x306   :  { %977 = vsyncpa [#allocation6 + $0x1], 1 }

</bundles_post_ra>
